<compile_context>
chip_gen: v7x
topology: tpu7x:2x2x1
jax: 0.10.0
libtpu: 0.0.40
codegen_flags: <defaults>
</compile_context>

<pallas_src>
import jax
import jax.numpy as jnp
from jax.experimental import pallas as pl
from jax.experimental.pallas import tpu as pltpu

BN_EPS = 1e-5
PAD = 128                     # lane-dense padded feature width
N_HIDDEN = 3                  # number of [Linear->ReLU->BN->Dropout] blocks
VEC_ROW = N_HIDDEN * PAD      # first row of the vector block inside the slab
SLAB_ROWS = VEC_ROW + 16      # 16 spare rows keep bf16 (16,128) tiling clean
TB = 512                      # batch tile for the pipelined large-batch path


def _mlp_kernel(x_ref, p_ref, o_ref):
    """Whole folded MLP; all operands VMEM-resident.

    x_ref: (B, input_dim) f32   unpadded input rows
    p_ref: (SLAB_ROWS, PAD) bf16 packed parameter slab:
             rows [i*128:(i+1)*128] : folded hidden-layer weight i
             row  384+i (i=0..2)    : folded bias b_i
             row  384+3             : folded final weight row w_out
             row  384+4, lane 0     : folded final bias b_out
    o_ref: (B, 1) f32
    """
    in_dim = x_ref.shape[1]

    # Hoist the whole vector block once; slice rows from the in-register value.
    v = p_ref[pl.ds(VEC_ROW, 8), :].astype(jnp.float32)      # (8, PAD) f32

    h = x_ref[...]                                            # (B, in_dim) f32
    for i in range(N_HIDDEN):                                 # static unroll (3)
        k = in_dim if i == 0 else PAD
        w = p_ref[pl.ds(i * PAD, k), :]                       # (k, PAD) bf16 view
        h = jnp.dot(h.astype(jnp.bfloat16), w,                # bf16 MXU, f32 acc
                    preferred_element_type=jnp.float32)
        h = jnp.maximum(h + v[i:i + 1, :], 0.0)               # bias + ReLU (f32 VPU)
        # BN of block i is folded into layer i+1's weights/bias; Dropout = identity.

    w_out = v[3:4, :]                                         # (1, PAD)
    b_out = v[4:5, 0:1]                                       # (1, 1), lane 0 only
    # N=1 output: VPU multiply + XLU lane reduction instead of a 1-column MXU matmul.
    o_ref[...] = (jnp.sum(h * w_out, axis=-1, keepdims=True) + b_out
                  ).astype(o_ref.dtype)


def make_params(key, input_dim, hidden_dims):
    """Deterministic synthetic parameters matching the nn.Sequential shapes."""
    params = []
    prev = input_dim
    for h in hidden_dims:
        key, kw, kb, kg, kbe, km, kv = jax.random.split(key, 7)
        w = jax.random.normal(kw, (prev, h), jnp.float32) * (1.0 / jnp.sqrt(prev))
        b = jax.random.normal(kb, (1, h), jnp.float32) * 0.01
        gamma = 1.0 + 0.1 * jax.random.normal(kg, (1, h), jnp.float32)
        beta = 0.1 * jax.random.normal(kbe, (1, h), jnp.float32)
        run_mean = 0.1 * jax.random.normal(km, (1, h), jnp.float32)
        run_var = jnp.abs(jax.random.normal(kv, (1, h), jnp.float32)) + 0.5
        params.append((w, b, gamma, beta, run_mean, run_var))
        prev = h
    key, kw, kb = jax.random.split(key, 3)
    w_out = jax.random.normal(kw, (prev, 1), jnp.float32) * (1.0 / jnp.sqrt(prev))
    b_out = jax.random.normal(kb, (1, 1), jnp.float32) * 0.01
    return params, (w_out, b_out)


def fold_and_pad_params(params, out_params, input_dim, hidden_dims, pad=PAD):
    """Host-side eval-mode BN folding + zero padding into ONE f32 slab.

    BN (after ReLU) of block i folds into the NEXT Linear:
        a = scale*relu(xW+b) + shift
        a @ Wn + bn == relu(xW+b) @ (scale[:,None]*Wn) + (shift@Wn + bn)
    Padded entries stay exactly zero (invariant the kernel relies on).
    """
    slab = jnp.zeros((SLAB_ROWS, pad), jnp.float32)

    prev_scale = None
    prev_shift = None
    prev_dim = input_dim
    for i, (w, b, gamma, beta, mean, var) in enumerate(params):
        h = hidden_dims[i]
        if prev_scale is None:
            w_f = w
            b_f = b.reshape(-1)
        else:
            w_f = prev_scale.reshape(-1, 1) * w
            b_f = b.reshape(-1) + prev_shift @ w
        slab = slab.at[i * pad: i * pad + prev_dim, :h].set(w_f)
        slab = slab.at[VEC_ROW + i, :h].set(b_f)

        scale = gamma.reshape(-1) * jax.lax.rsqrt(var.reshape(-1) + BN_EPS)
        shift = beta.reshape(-1) - scale * mean.reshape(-1)
        prev_scale, prev_shift = scale, shift
        prev_dim = h

    w_out, b_out = out_params                               # (prev_dim, 1), (1, 1)
    w3 = (prev_scale.reshape(-1, 1) * w_out)[:, 0]          # (prev_dim,)
    b3 = b_out.reshape(()) + prev_shift @ w_out[:, 0]       # scalar
    slab = slab.at[VEC_ROW + 3, :prev_dim].set(w3)
    slab = slab.at[VEC_ROW + 4, 0].set(b3)                  # single lane is enough
    return slab                                             # f32; caller casts to bf16


@jax.jit
def text_to_regression_forward(x, p_slab):
    batch, in_dim = x.shape
    flops = batch * (2 * (in_dim * PAD + (N_HIDDEN - 1) * PAD * PAD) + 2 * PAD)
    bytes_acc = (x.size * x.dtype.itemsize
                 + p_slab.size * p_slab.dtype.itemsize
                 + batch * 4)
    cost = pl.CostEstimate(flops=flops, transcendentals=0, bytes_accessed=bytes_acc)

    if batch <= TB:
        # Grid-less: ~100 KiB of params + x fully VMEM-resident, exactly 2 input DMAs.
        return pl.pallas_call(
            _mlp_kernel,
            out_shape=jax.ShapeDtypeStruct((batch, 1), jnp.float32),
            in_specs=[pl.BlockSpec(memory_space=pltpu.MemorySpace.VMEM)] * 2,
            out_specs=pl.BlockSpec(memory_space=pltpu.MemorySpace.VMEM),
            cost_estimate=cost,
        )(x, p_slab)

    # Large-batch path: 1-D pipelined grid over batch rows.  The weight slab's
    # index_map is constant so it stays VMEM-resident across steps; x/out blocks
    # double-buffer and overlap DMA with the 3 matmuls.  Per-step VMEM
    # (2*2*TB*in_dim*4 + slab + 2*TB*4) << 32 MiB default scoped limit, so this
    # single config is portable across v5e/v6e/v7x (incl. v7x's 64 MiB VMEM).
    return pl.pallas_call(
        _mlp_kernel,
        out_shape=jax.ShapeDtypeStruct((batch, 1), jnp.float32),
        grid=(pl.cdiv(batch, TB),),
        in_specs=[pl.BlockSpec((TB, in_dim), lambda i: (i, 0)),
                  pl.BlockSpec((SLAB_ROWS, PAD), lambda i: (0, 0))],
        out_specs=pl.BlockSpec((TB, 1), lambda i: (i, 0)),
        compiler_params=pltpu.CompilerParams(
            dimension_semantics=("parallel",)),   # v7x: batch split across 2 TCs
        cost_estimate=cost,
    )(x, p_slab)


def folded_reference(x, p_slab):
    """Pure-JAX mirror of the kernel math on the packed slab (any slab dtype)."""
    in_dim = x.shape[1]
    v = p_slab[VEC_ROW:VEC_ROW + 8, :].astype(jnp.float32)
    h = x.astype(jnp.float32)
    for i in range(N_HIDDEN):
        k = in_dim if i == 0 else PAD
        w = p_slab[i * PAD: i * PAD + k, :]
        h = jnp.dot(h.astype(p_slab.dtype), w, preferred_element_type=jnp.float32)
        h = jnp.maximum(h + v[i:i + 1, :], 0.0)
    return jnp.sum(h * v[3:4, :], axis=-1, keepdims=True) + v[4:5, 0:1]


def reference_forward(x, params, out_params):
    """Pure-JAX reference with the ORIGINAL (unfused) Linear->ReLU->BN semantics."""
    h = x.astype(jnp.float32)
    for (w, b, g, be, m, v) in params:
        h = h @ w + b
        h = jnp.maximum(h, 0.0)
        h = g * (h - m) * jax.lax.rsqrt(v + BN_EPS) + be
    w_out, b_out = out_params
    return h @ w_out + b_out


if __name__ == "__main__":
    key = jax.random.PRNGKey(0)
    key, kx, kp, kx2 = jax.random.split(key, 4)

    batch = 8
    input_dim = 32
    hidden_dims = [128, 64, 32]

    # x plays the role of already-looked-up CBOW embeddings: (batch, input_dim).
    # TODO(synk): nn.Embedding lookup / Vocabulary loading is constructor-side
    # file I/O, not part of forward(); x is the embedded input here.
    x = jax.random.normal(kx, (batch, input_dim), jnp.float32)

    params, out_params = make_params(kp, input_dim, hidden_dims)
    slab_f32 = fold_and_pad_params(params, out_params, input_dim, hidden_dims)
    p_slab = slab_f32.astype(jnp.bfloat16)    # bf16 weights: halve HBM traffic

    y = jax.block_until_ready(text_to_regression_forward(x, p_slab))
    assert y.shape == (batch, 1)

    y_ref = reference_forward(x, params, out_params)

    # (1) BN-folding algebra is exact (checked in f32, independent of quantization).
    assert jnp.allclose(folded_reference(x, slab_f32), y_ref, atol=1e-3, rtol=1e-3)

    # (2) Kernel plumbing matches an exactly bf16-matched JAX reference (tight).
    assert jnp.allclose(y, folded_reference(x, p_slab), atol=1e-3, rtol=1e-3)

    # (3) Against the original unfused f32 semantics; the only gap is the
    #     deliberate bf16 weight quantization (~1% level), hence the looser tol.
    assert jnp.allclose(y, y_ref, atol=1e-1, rtol=1e-1)

    # (4) Exercise the pipelined large-batch grid path (parallel batch axis).
    xb = jax.random.normal(kx2, (2048, input_dim), jnp.float32)
    yb = jax.block_until_ready(text_to_regression_forward(xb, p_slab))
    assert yb.shape == (2048, 1)
    assert jnp.allclose(yb, folded_reference(xb, p_slab), atol=1e-3, rtol=1e-3)

    print("KERNEL_OK")
</pallas_src>

<mosaic_0001>
module attributes {stable_mosaic.version = 11 : i64} {
  func.func @_mlp_kernel(%arg0: memref<8x32xf32, #tpu.memory_space<vmem>>, %arg1: memref<400x128xbf16, #tpu.memory_space<vmem>>, %arg2: memref<8x1xf32, #tpu.memory_space<vmem>>) attributes {dimension_semantics = [], scalar_prefetch = 0 : i64, scratch_operands = 0 : i64, tpu.core_type = #tpu.core_type<tc>} {
    %c384 = arith.constant 384 : index
    %c0 = arith.constant 0 : index
    %0 = vector.load %arg1[%c384, %c0] : memref<400x128xbf16, #tpu.memory_space<vmem>>, vector<8x128xbf16>
    %1 = arith.extf %0 : vector<8x128xbf16> to vector<8x128xf32>
    %c0_0 = arith.constant 0 : index
    %c0_1 = arith.constant 0 : index
    %2 = vector.load %arg0[%c0_0, %c0_1] : memref<8x32xf32, #tpu.memory_space<vmem>>, vector<8x32xf32>
    %c0_2 = arith.constant 0 : index
    %c0_3 = arith.constant 0 : index
    %3 = vector.load %arg1[%c0_2, %c0_3] : memref<400x128xbf16, #tpu.memory_space<vmem>>, vector<32x128xbf16>
    %4 = arith.truncf %2 : vector<8x32xf32> to vector<8x32xbf16>
    %cst = arith.constant dense<0.000000e+00> : vector<8x128xf32>
    %5 = tpu.matmul %4, %3, %cst {dimension_numbers = #tpu.dot_dimension_numbers<[1], [0], [0], [1], [0, 0, 1, 1], [], []>} : vector<8x32xbf16>, vector<32x128xbf16>, vector<8x128xf32> -> vector<8x128xf32>
    %6 = vector.extract_strided_slice %1 {offsets = [0, 0], sizes = [1, 128], strides = [1, 1]} : vector<8x128xf32> to vector<1x128xf32>
    %7 = vector.broadcast %6 : vector<1x128xf32> to vector<8x128xf32>
    %8 = arith.addf %5, %7 : vector<8x128xf32>
    %cst_4 = arith.constant 0.000000e+00 : f32
    %9 = vector.broadcast %cst_4 : f32 to vector<8x128xf32>
    %10 = arith.maximumf %8, %9 : vector<8x128xf32>
    %c128 = arith.constant 128 : index
    %c0_5 = arith.constant 0 : index
    %11 = vector.load %arg1[%c128, %c0_5] : memref<400x128xbf16, #tpu.memory_space<vmem>>, vector<128x128xbf16>
    %12 = arith.truncf %10 : vector<8x128xf32> to vector<8x128xbf16>
    %cst_6 = arith.constant dense<0.000000e+00> : vector<8x128xf32>
    %13 = tpu.matmul %12, %11, %cst_6 {dimension_numbers = #tpu.dot_dimension_numbers<[1], [0], [0], [1], [0, 0, 1, 1], [], []>} : vector<8x128xbf16>, vector<128x128xbf16>, vector<8x128xf32> -> vector<8x128xf32>
    %14 = vector.extract_strided_slice %1 {offsets = [1, 0], sizes = [1, 128], strides = [1, 1]} : vector<8x128xf32> to vector<1x128xf32>
    %15 = vector.broadcast %14 : vector<1x128xf32> to vector<8x128xf32>
    %16 = arith.addf %13, %15 : vector<8x128xf32>
    %cst_7 = arith.constant 0.000000e+00 : f32
    %17 = vector.broadcast %cst_7 : f32 to vector<8x128xf32>
    %18 = arith.maximumf %16, %17 : vector<8x128xf32>
    %c256 = arith.constant 256 : index
    %c0_8 = arith.constant 0 : index
    %19 = vector.load %arg1[%c256, %c0_8] : memref<400x128xbf16, #tpu.memory_space<vmem>>, vector<128x128xbf16>
    %20 = arith.truncf %18 : vector<8x128xf32> to vector<8x128xbf16>
    %cst_9 = arith.constant dense<0.000000e+00> : vector<8x128xf32>
    %21 = tpu.matmul %20, %19, %cst_9 {dimension_numbers = #tpu.dot_dimension_numbers<[1], [0], [0], [1], [0, 0, 1, 1], [], []>} : vector<8x128xbf16>, vector<128x128xbf16>, vector<8x128xf32> -> vector<8x128xf32>
    %22 = vector.extract_strided_slice %1 {offsets = [2, 0], sizes = [1, 128], strides = [1, 1]} : vector<8x128xf32> to vector<1x128xf32>
    %23 = vector.broadcast %22 : vector<1x128xf32> to vector<8x128xf32>
    %24 = arith.addf %21, %23 : vector<8x128xf32>
    %cst_10 = arith.constant 0.000000e+00 : f32
    %25 = vector.broadcast %cst_10 : f32 to vector<8x128xf32>
    %26 = arith.maximumf %24, %25 : vector<8x128xf32>
    %27 = vector.extract_strided_slice %1 {offsets = [3, 0], sizes = [1, 128], strides = [1, 1]} : vector<8x128xf32> to vector<1x128xf32>
    %28 = vector.extract_strided_slice %1 {offsets = [4, 0], sizes = [1, 1], strides = [1, 1]} : vector<8x128xf32> to vector<1x1xf32>
    %29 = vector.broadcast %27 : vector<1x128xf32> to vector<8x128xf32>
    %30 = arith.mulf %26, %29 : vector<8x128xf32>
    %cst_11 = arith.constant dense<0.000000e+00> : vector<8xf32>
    %31 = vector.multi_reduction <add>, %30, %cst_11 [1] : vector<8x128xf32> to vector<8xf32>
    %32 = vector.shape_cast %31 : vector<8xf32> to vector<8x1xf32>
    %33 = vector.broadcast %28 : vector<1x1xf32> to vector<8x1xf32>
    %34 = arith.addf %32, %33 : vector<8x1xf32>
    %c0_12 = arith.constant 0 : index
    %c0_13 = arith.constant 0 : index
    %35 = vector.load %arg2[%c0_12, %c0_13] : memref<8x1xf32, #tpu.memory_space<vmem>>, vector<8x1xf32>
    tpu.vector_store %arg2[%c0_12, %c0_13], %34 {strides = array<i32>} : memref<8x1xf32, #tpu.memory_space<vmem>>, vector<8x1xf32>,
    return
  }
}

</mosaic_0001>

<bundles_post_ra>
// kernel: text_to_regression_forward.1
= control target key start
LH: loop header
LB: loop body
LE: loop exit
PB: predicated region body
PF: predicated region fallthrough
CT: control target
= control target key end

     0   :  { %7 = vsyncpa [#allocation3], 0  ;;  %s586_s0 = inlined_call_operand.hbm [shape: f32[8,32], index: 0, kind: input, shape index: {}]   ;;  %s587_s1 = inlined_call_operand.hbm [shape: bf16[400,128], index: 1, kind: input, shape index: {}]   ;;  %s588_s2 = inlined_call_operand.vmem [shape: f32[8,1], index: 2, kind: output, shape index: {}]  }
   0x1   :  { %8 = vsyncpa [#allocation5], 0  ;;  %s507_s9 = smov [#allocation2]   ;;  %s508_s11 = smov [#allocation4]  }
   0x2   :  { %s15_s10 = sshll.u32 %s507_s9, 4  ;;  %s24_s12 = sshll.u32 %s508_s11, 4  ;;  %s16_s10 = int_to_ptr.vmem [resolvable:$true] %s15_s10  ;;  %s528_s12 = int_to_ptr.vmem [resolvable:$true] %s24_s12 }
   0x3   :  { %s459_s15 = scalar_lea.hbm %s586_s0, 128 }
   0x4   :  { %p460_p0 = scmp.ne.s32.totalorder %s586_s0, %s459_s15  ;;  %p463_p1 = scmp.lt.u32.totalorder %s459_s15, %s586_s0 }
   0x6   :  { %p465_p2 = pnand %p463_p1, %p460_p0 }
   0x8   :  { %468 = shalt.err (!%p465_p2)
}
   0x9   :  { %s469_s20 = scalar_lea.vmem %s16_s10, 128  ;;  %p474_p4 = scmp.lt.s32.totalorder %s16_s10, %s16_s10 }
   0xa   :  { %p470_p3 = scmp.ne.s32.totalorder %s16_s10, %s469_s20  ;;  %p475_p5 = scmp.lt.s32.totalorder %s469_s20, %s469_s20 }
   0xc   :  { %p476_p6 = por %p475_p5, %p474_p4 }
   0xe   :  { %p477_p7 = pnand %p476_p6, %p470_p3 }
  0x10   :  { %480 = shalt.err (!%p477_p7)
}
  0x11   :  { %18 = dma.hbm_to_vmem [thread:$0]  %s586_s0, 128, %s16_s10, [#allocation3]  }
  0x12   :  { %s481_s25 = scalar_lea.hbm %s587_s1, 3200 }
  0x13   :  { %p482_p8 = scmp.ne.s32.totalorder %s587_s1, %s481_s25  ;;  %p485_p9 = scmp.lt.u32.totalorder %s481_s25, %s587_s1 }
  0x15   :  { %p487_p10 = pnand %p485_p9, %p482_p8 }
  0x17   :  { %490 = shalt.err (!%p487_p10)
}
  0x18   :  { %s491_s30 = scalar_lea.vmem %s528_s12, 3200  ;;  %p496_p12 = scmp.lt.s32.totalorder %s528_s12, %s528_s12 }
  0x19   :  { %p492_p11 = scmp.ne.s32.totalorder %s528_s12, %s491_s30  ;;  %p497_p13 = scmp.lt.s32.totalorder %s491_s30, %s491_s30 }
  0x1b   :  { %p498_p0 = por %p497_p13, %p496_p12 }
  0x1d   :  { %p499_p1 = pnand %p498_p0, %p492_p11 }
  0x1f   :  { %502 = shalt.err (!%p499_p1)
}
  0x20   :  { %s509_s0 = smov 64   ;;  %s510_s3 = smov 4  }
  0x21   :  { %30 = dma.hbm_to_vmem [thread:$0]  %s587_s1, 3200, %s528_s12, [#allocation5], %s509_s0, %s509_s0, %s510_s3  }
  0x22   :  { %503 = dma.done.wait [#allocation3], 128  }
  0x23   :  { %504 = vsyncadd [#allocation3], 4294967168 }
  0x24   :  { %505 = dma.done.wait [#allocation5], 3200  }
  0x25   :  { %506 = vsyncadd [#allocation5], 4294964096  ;;  %v511_v0 = vmov 0.0   ;;  %vm512_vm0 = vmmov 0   ;;  %v441_v1 = vld [vmem:[#allocation4] sm:$0xff]   ;;  %v442_v2 = vld [vmem:[#allocation4 + $0x8] sm:$0xff]   ;;  %v46_v19 = vlaneseq }
  0x26   :  { %387 = vmatprep.subr.bf16.mxu0 %v511_v0  ;;  %391 = vmatprep.mubr.msk.bf16.mxu0 %vm512_vm0, %v511_v0  ;;  %v40_v3 = vld [vmem:[#allocation2] sm:$0xff]  ;;  %v443_v4 = vld [vmem:[#allocation4 + $0x40] sm:$0xff]   ;;  %v444_v6 = vld [vmem:[#allocation4 + $0x48] sm:$0xff]   ;;  %vm62_vm1 = vcmask 261120   ;;  %vm339_vm2 = vcmask 7168  }
  0x27   :  { %395 = vmatprep.subr.bf16.mxu1 %v511_v0  ;;  %411 = vmatprep.mubr.msk.bf16.mxu1 %vm512_vm0, %v511_v0  ;;  %v45_v5 = vpack.c.bf16 %v40_v3, %v40_v3  ;;  %v445_v7 = vld [vmem:[#allocation4 + $0x50] sm:$0xff]   ;;  %v446_v8 = vld [vmem:[#allocation4 + $0x58] sm:$0xff]   ;;  %v447_v9 = vld [vmem:[#allocation4 + $0x60] sm:$0xff]   ;;  %v47_v20 = vshrl.u32 %v46_v19, 7 }
  0x28   :  { %388 = vmatpush3.bf16.msra.mxu0 %v441_v1  ;;  %396 = vmatpush3.bf16.msra.mxu1 %v443_v4  ;;  %v448_v10 = vld [vmem:[#allocation4 + $0x68] sm:$0xff]   ;;  %v449_v11 = vld [vmem:[#allocation4 + $0x70] sm:$0xff]   ;;  %v450_v12 = vld [vmem:[#allocation4 + $0x78] sm:$0xff]  }
  0x29   :  { %389 = vmatprep.subr.bf16.mxu0 %v511_v0  ;;  %397 = vmatprep.subr.bf16.mxu1 %v511_v0  ;;  %v451_v13 = vld [vmem:[#allocation4 + $0x80] sm:$0xff]   ;;  %v452_v14 = vld [vmem:[#allocation4 + $0x88] sm:$0xff]   ;;  %v453_v15 = vld [vmem:[#allocation4 + $0x90] sm:$0xff]   ;;  %v48_v23 = vsub.s32 0, %v47_v20  ;;  %v126_v34 = vsub.s32 1, %v47_v20  ;;  %v236_v43 = vsub.s32 2, %v47_v20 }
  0x2a   :  { %v454_v16 = vld [vmem:[#allocation4 + $0x98] sm:$0xff]   ;;  %v455_v17 = vld [vmem:[#allocation4 + $0xa0] sm:$0xff]   ;;  %v456_v18 = vld [vmem:[#allocation4 + $0xa8] sm:$0xff]   ;;  %v329_v45 = vsub.s32 3, %v47_v20  ;;  %v336_v54 = vsub.s32 4, %v47_v20 }
  0x2b   :  { %v38_v21 = vld [vmem:[#allocation4 + $0xc0] sm:$0xf]  ;;  %v457_v32 = vld [vmem:[#allocation4 + $0xb0] sm:$0xff]   ;;  %v458_v33 = vld [vmem:[#allocation4 + $0xb8] sm:$0xff]  }
  0x2c   :  { %390 = vmatpush3.bf16.msra.mxu0 %v442_v2  ;;  %398 = vmatpush3.bf16.msra.mxu1 %v444_v6  ;;  %v39_v22 = vunpack.c.l.bf16 %v38_v21 }
  0x2d   :  { %415 = vmatprep.subr.bf16.mxu0 %v511_v0  ;;  %399 = vmatprep.subr.bf16.mxu1 %v511_v0 }
  0x2e   :  { %v49_v24 = vrot.slane %v39_v22, %v48_v23  ;;  %v127_v35 = vrot.slane %v39_v22, %v126_v34  ;;  %v237_v44 = vrot.slane %v39_v22, %v236_v43  ;;  %v330_v49 = vrot.slane %v39_v22, %v329_v45 }
  0x2f   :  { %392 = vmatmul.mubr.msk.bf16.vlgmr.msra.gmra.mrb[0].mxu0 %vm62_vm1, %v45_v5  ;;  %v337_v55 = vrot.slane %v39_v22, %v336_v54 }
  0x30   :  { %431 = vmatprep.mubr.msk.bf16.mxu0 %vm512_vm0, %v511_v0  ;;  %400 = vmatpush3.bf16.msra.mxu1 %v445_v7 }
  0x31   :  { %401 = vmatprep.subr.bf16.mxu1 %v511_v0  ;;  %416 = vmatpush3.bf16.msra.mxu0 %v451_v13 }
  0x32   :  { %417 = vmatprep.subr.bf16.mxu0 %v511_v0 }
  0x34   :  { %402 = vmatpush3.bf16.msra.mxu1 %v446_v8 }
  0x35   :  { %403 = vmatprep.subr.bf16.mxu1 %v511_v0  ;;  %418 = vmatpush3.bf16.msra.mxu0 %v452_v14 }
  0x36   :  { %419 = vmatprep.subr.bf16.mxu0 %v511_v0 }
  0x38   :  { %404 = vmatpush3.bf16.msra.mxu1 %v447_v9 }
  0x39   :  { %405 = vmatprep.subr.bf16.mxu1 %v511_v0  ;;  %420 = vmatpush3.bf16.msra.mxu0 %v453_v15 }
  0x3a   :  { %421 = vmatprep.subr.bf16.mxu0 %v511_v0 }
  0x3c   :  { %406 = vmatpush3.bf16.msra.mxu1 %v448_v10 }
  0x3d   :  { %407 = vmatprep.subr.bf16.mxu1 %v511_v0  ;;  %422 = vmatpush3.bf16.msra.mxu0 %v454_v16 }
  0x3e   :  { %423 = vmatprep.subr.bf16.mxu0 %v511_v0 }
  0x40   :  { %408 = vmatpush3.bf16.msra.mxu1 %v449_v11 }
  0x41   :  { %409 = vmatprep.subr.bf16.mxu1 %v511_v0  ;;  %424 = vmatpush3.bf16.msra.mxu0 %v455_v17 }
  0x42   :  { %425 = vmatprep.subr.bf16.mxu0 %v511_v0 }
  0x44   :  { %410 = vmatpush3.bf16.msra.mxu1 %v450_v12 }
  0x45   :  { %426 = vmatpush3.bf16.msra.mxu0 %v456_v18 }
  0x46   :  { %427 = vmatprep.subr.bf16.mxu0 %v511_v0 }
  0x49   :  { %428 = vmatpush3.bf16.msra.mxu0 %v457_v32 }
  0x4a   :  { %429 = vmatprep.subr.bf16.mxu0 %v511_v0 }
  0x4d   :  { %430 = vmatpush3.bf16.msra.mxu0 %v458_v33 }
 0x102   :  { %v100_v25 = vpop.f32.mrb[0].mxu0 }
 0x103   :  { %v101_v26 = vadd.f32 %v100_v25, %v49_v24  ;;  %v393_v27 = vpop.f32.mrb[1].mxu0 }
 0x104   :  { %v103_v28 = vpop.f32.mrb[2].mxu0 }
 0x105   :  { %v106_v29 = vmax.f32 %v101_v26, 0.0  ;;  %v394_v30 = vpop.f32.mrb[3].mxu0 }
 0x107   :  { %v123_v31 = vpack.c.bf16 %v106_v29, %v106_v29 }
 0x109   :  { %412 = vmatmul.mubr.bf16.vlgmr.msra.gmra.mrb[0].mxu1 %v123_v31 }
 0x1dc   :  { %v210_v36 = vpop.f32.mrb[0].mxu1 }
 0x1dd   :  { %v211_v37 = vadd.f32 %v210_v36, %v127_v35  ;;  %v413_v38 = vpop.f32.mrb[1].mxu1 }
 0x1de   :  { %v213_v39 = vpop.f32.mrb[2].mxu1 }
 0x1df   :  { %v216_v40 = vmax.f32 %v211_v37, 0.0  ;;  %v414_v41 = vpop.f32.mrb[3].mxu1 }
 0x1e1   :  { %v233_v42 = vpack.c.bf16 %v216_v40, %v216_v40 }
 0x1e3   :  { %432 = vmatmul.mubr.bf16.vlgmr.msra.gmra.mrb[4].mxu0 %v233_v42 }
 0x2b6   :  { %v320_v46 = vpop.f32.mrb[4].mxu0 }
 0x2b7   :  { %v321_v47 = vadd.f32 %v320_v46, %v237_v44  ;;  %v433_v48 = vpop.f32.mrb[5].mxu0 }
 0x2b8   :  { %v323_v50 = vpop.f32.mrb[6].mxu0 }
 0x2b9   :  { %v326_v51 = vmax.f32 %v321_v47, 0.0  ;;  %v434_v52 = vpop.f32.mrb[7].mxu0 }
 0x2bb   :  { %v331_v53 = vmul.f32 %v330_v49, %v326_v51 }
 0x2bd   :  { %332 = vadd.xlane.f32.xlu0 %v331_v53 }
 0x34a   :  { %v333_v56 = vpop.xlane.xlu0 %332 }
 0x34b   :  { %v338_v57 = vadd.f32 %v337_v55, %v333_v56 }
 0x34d   :  { %340 = vst.msk [vmem:[%s588_s2] sm:$0xff] %vm339_vm2, %v338_v57 }
 0x34e   :  { %345 = vsyncpa [#allocation3], 1 }
 0x34f   :  { %346 = vsyncpa [#allocation5], 1 }

</bundles_post_ra>
